<compile_context>
chip_gen: v7x
topology: tpu7x:2x2x1
jax: 0.10.0
libtpu: 0.0.40
codegen_flags: <defaults>
</compile_context>

<pallas_src>
import functools

import numpy as np

import jax
import jax.numpy as jnp
from jax.experimental import pallas as pl
from jax.experimental.pallas import tpu as pltpu


def _round_up(x, m):
    return (x + m - 1) // m * m


def _tpu_vmem_bytes():
    """Best-effort VMEM capacity query (only used to pick tile sizes)."""
    try:
        return int(pltpu.get_tpu_info().vmem_capacity_bytes)
    except Exception:
        return 64 * 1024 * 1024  # conservative (v7x-sized) fallback


def _pick_spatial_tile(c, s, stream_itemsize, vmem_limit, tile_s=None):
    """Lane-aligned spatial tile size from the real (padded) VMEM footprint."""
    s_lanes = _round_up(s, 128)
    if tile_s is not None:
        return min(_round_up(max(int(tile_s), 128), 128), s_lanes)

    # Sublane packing of the streamed pred dtype (f32 -> 8, bf16 -> 16 rows).
    c_pad_in = _round_up(c, 32 // stream_itemsize)
    c_pad_f32 = _round_up(c, 8)
    per_lane = (
        2 * c_pad_in * stream_itemsize   # double-buffered pred input tile
        + 2 * 32                         # double-buffered label tile (1 row pads to a full sublane group)
        + 4 * c_pad_f32 * 4              # ~4 live f32 intermediates (p, e, sm, select)
    )
    budget = vmem_limit // 2             # leave headroom for compiler scratch
    ts = (budget // per_lane) // 128 * 128
    # Also keep one (padded) pred block itself in the multi-MiB roofline range.
    max_by_block = (8 * 1024 * 1024) // (c_pad_in * stream_itemsize) // 128 * 128
    ts = min(ts, max_by_block)
    ts = max(128, ts)
    return min(ts, s_lanes)


def _dice_kernel(pred_ref, tgt_ref, num_ref, den_ref, *, approx_recip):
    """One (batch, S-split, S-tile) grid step.

    pred_ref : (1, C, TS) logits block (streamed dtype, upcast in-kernel)
    tgt_ref  : (1, 1, TS) int8/int32 labels (padded lanes hold -1)
    num_ref  : (1, 1, 1, C) f32   sum(target * softmax)        (accumulator)
    den_ref  : (1, 1, 1, C) f32   sum(target) + sum(softmax)   (accumulator)
    """
    si = pl.program_id(2)

    @pl.when(si == 0)
    def _():
        num_ref[...] = jnp.zeros_like(num_ref)
        den_ref[...] = jnp.zeros_like(den_ref)

    p = pred_ref[...].astype(jnp.float32)        # (1, C, TS)
    t = tgt_ref[...].astype(jnp.int32)           # (1, 1, TS)

    # Numerically stable softmax over the channel (sublane) axis, per pixel.
    m = jnp.max(p, axis=1, keepdims=True)        # (1, 1, TS)
    e = jnp.exp(p - m)                           # (1, C, TS)   EUP
    z = jnp.sum(e, axis=1, keepdims=True)        # (1, 1, TS)
    inv_z = pl.reciprocal(z, approx=approx_recip)  # EUP slot, frees VALU
    sm = e * inv_z                               # (1, C, TS)

    c = p.shape[1]
    cls = jax.lax.broadcasted_iota(jnp.int32, (1, c, 1), 1)   # (1, C, 1)
    match = t == cls                                          # (1, C, TS) bool
    # No spatial mask: padded label lanes are -1 -> never match (num clean);
    # padded pred lanes are all-zero logits -> add exactly 1/C per class to
    # den, corrected analytically in the wrapper.

    num_ref[...] += jnp.sum(jnp.where(match, sm, 0.0), axis=-1).reshape(1, 1, 1, c)
    den_ref[...] += jnp.sum(jnp.where(match, sm + 1.0, sm), axis=-1).reshape(1, 1, 1, c)


def dice_loss_softmax(pred, target, smooth=1e-4,
                      stream_dtype=jnp.bfloat16, tile_s=None):
    """loss = 1 - mean_n mean_c dice(n, c)   (matches DiceLossSoftmax.forward).

    stream_dtype: dtype used for the HBM pred stream (bf16 halves bandwidth;
                  pass None to keep the input dtype bit-exact).
    tile_s:       optional forced spatial tile size (testing).
    """
    n, c, h, w = pred.shape
    s = h * w

    if stream_dtype is None:
        stream_dtype = pred.dtype
    stream_dtype = np.dtype(stream_dtype)
    approx_recip = stream_dtype == np.dtype(jnp.bfloat16)  # already loose precision

    vmem = _tpu_vmem_bytes()
    vmem_limit = (48 * 1024 * 1024 if vmem <= 64 * 1024 * 1024
                  else 64 * 1024 * 1024)

    ts = _pick_spatial_tile(c, s, stream_dtype.itemsize, vmem_limit, tile_s)

    n_tiles = -(-s // ts)                       # ceil(S / TS)
    n_split = 2 if n_tiles >= 2 else 1          # 2nd parallel axis (v7x megacore)
    tiles_per_split = -(-n_tiles // n_split)
    n_tiles = tiles_per_split * n_split
    s_pad = n_tiles * ts

    # ---- wrapper-side layout plumbing --------------------------------------
    pred_r = pred.reshape(n, c, s).astype(stream_dtype)
    lbl_dtype = jnp.int8 if c <= 127 else jnp.int32
    tgt_r = target.reshape(n, 1, s).astype(lbl_dtype)
    if s_pad != s:
        pred_r = jnp.pad(pred_r, ((0, 0), (0, 0), (0, s_pad - s)))
        tgt_r = jnp.pad(tgt_r, ((0, 0), (0, 0), (0, s_pad - s)),
                        constant_values=-1)     # out-of-range class

    kernel = functools.partial(_dice_kernel, approx_recip=approx_recip)
    out_sds = jax.ShapeDtypeStruct((n, n_split, 1, c), jnp.float32)

    num_out, den_out = pl.pallas_call(
        kernel,
        out_shape=(out_sds, out_sds),
        grid=(n, n_split, tiles_per_split),
        in_specs=[
            pl.BlockSpec((1, c, ts),
                         lambda b, p, si: (b, 0, p * tiles_per_split + si)),
            pl.BlockSpec((1, 1, ts),
                         lambda b, p, si: (b, 0, p * tiles_per_split + si)),
        ],
        # Disjoint per-(batch, split) output blocks -> both leading grid axes
        # can be "parallel" (megacore); blocks stay VMEM-resident across the
        # inner "arbitrary" spatial reduction and are written back once.
        out_specs=(
            pl.BlockSpec((1, 1, 1, c), lambda b, p, si: (b, p, 0, 0)),
            pl.BlockSpec((1, 1, 1, c), lambda b, p, si: (b, p, 0, 0)),
        ),
        compiler_params=pltpu.CompilerParams(
            dimension_semantics=("parallel", "parallel", "arbitrary"),
            vmem_limit_bytes=vmem_limit,
        ),
    )(pred_r, tgt_r)

    num = jnp.sum(num_out[:, :, 0, :], axis=1)       # (n, c)
    den = jnp.sum(den_out[:, :, 0, :], axis=1)       # (n, c)
    # Analytic padding correction: each padded pixel (all-zero logits) added
    # exactly 1/C to sum(softmax) for every class.
    den = den - (s_pad - s) / float(c)
    dice = (2.0 * num + smooth) / (den + smooth)     # (n, c)
    # mean over classes then over batch == mean over all (n, c) entries.
    return 1.0 - jnp.mean(dice)


def _reference_loss(pred, target, smooth=1e-4):
    """Pure-JAX reference mirroring the PyTorch module."""
    n, c = pred.shape[:2]
    sm = jax.nn.softmax(pred.astype(jnp.float32), axis=1)
    oh = jax.nn.one_hot(target, c, axis=1, dtype=jnp.float32)   # (N, C, H, W)
    p = sm.reshape(n, c, -1)
    t = oh.reshape(n, c, -1)
    inter = jnp.sum(t * p, axis=-1)
    dice = (2.0 * inter + smooth) / (jnp.sum(t, -1) + jnp.sum(p, -1) + smooth)
    return 1.0 - jnp.mean(jnp.mean(dice, axis=-1))


if __name__ == "__main__":
    key = jax.random.PRNGKey(0)
    k1, k2, k3, k4 = jax.random.split(key, 4)

    # ---- test 1: basic shape, single tile, no padding ----------------------
    N, C, H, W = 2, 4, 16, 16
    pred = jax.random.normal(k1, (N, C, H, W), dtype=jnp.float32)
    target = jax.random.randint(k2, (N, H, W), 0, C, dtype=jnp.int32)
    ref = _reference_loss(pred, target)

    # Bit-careful path: f32 stream + exact reciprocal.
    loss_exact = jax.block_until_ready(
        dice_loss_softmax(pred, target, stream_dtype=None))
    assert jnp.allclose(loss_exact, ref, atol=1e-5, rtol=1e-5), (loss_exact, ref)

    # Default fast path: bf16 HBM stream + approx (EUP) reciprocal.
    loss_fast = jax.block_until_ready(dice_loss_softmax(pred, target))
    assert jnp.allclose(loss_fast, ref, atol=5e-3, rtol=5e-3), (loss_fast, ref)

    # ---- test 2: ragged spatial size -> exercises the analytic padding
    #      correction, multi-tile reduction, and the 2-way S-split axis ------
    N2, C2, H2, W2 = 1, 5, 17, 19
    pred2 = jax.random.normal(k3, (N2, C2, H2, W2), dtype=jnp.float32)
    target2 = jax.random.randint(k4, (N2, H2, W2), 0, C2, dtype=jnp.int32)
    ref2 = _reference_loss(pred2, target2)
    loss2 = jax.block_until_ready(
        dice_loss_softmax(pred2, target2, stream_dtype=None, tile_s=128))
    assert jnp.allclose(loss2, ref2, atol=1e-5, rtol=1e-5), (loss2, ref2)

    print("KERNEL_OK")
</pallas_src>

<mosaic_0001>
module attributes {stable_mosaic.version = 11 : i64} {
  func.func @_dice_kernel(%arg0: i32, %arg1: i32, %arg2: i32, %arg3: memref<1x4x256xf32, #tpu.memory_space<vmem>>, %arg4: memref<1x1x256xi8, #tpu.memory_space<vmem>>, %arg5: memref<1x1x1x4xf32, #tpu.memory_space<vmem>>, %arg6: memref<1x1x1x4xf32, #tpu.memory_space<vmem>>) attributes {dimension_semantics = [#tpu.dimension_semantics<parallel>, #tpu.dimension_semantics<parallel>, #tpu.dimension_semantics<arbitrary>], iteration_bounds = array<i64: 2, 1, 1>, scalar_prefetch = 0 : i64, scratch_operands = 0 : i64, tpu.core_type = #tpu.core_type<tc>, window_params = [{transform_indices = @transform_0, window_bounds = array<i64: 1, 4, 256>}, {transform_indices = @transform_1, window_bounds = array<i64: 1, 1, 256>}, {transform_indices = @transform_2, window_bounds = array<i64: 1, 1, 1, 4>}, {transform_indices = @transform_3, window_bounds = array<i64: 1, 1, 1, 4>}]} {
    %c0_i32 = arith.constant 0 : i32
    %0 = arith.cmpi eq, %arg2, %c0_i32 : i32
    %1 = arith.extui %0 : i1 to i32
    %c0_i32_0 = arith.constant 0 : i32
    %2 = arith.cmpi ne, %1, %c0_i32_0 : i32
    scf.if %2 {
      %cst_27 = arith.constant 0.000000e+00 : f32
      %35 = vector.broadcast %cst_27 : f32 to vector<1x1x1x4xf32>
      %c0_28 = arith.constant 0 : index
      %c0_29 = arith.constant 0 : index
      %c0_30 = arith.constant 0 : index
      %c0_31 = arith.constant 0 : index
      %36 = vector.load %arg5[%c0_28, %c0_29, %c0_30, %c0_31] : memref<1x1x1x4xf32, #tpu.memory_space<vmem>>, vector<1x1x1x4xf32>
      tpu.vector_store %arg5[%c0_28, %c0_29, %c0_30, %c0_31], %35 {strides = array<i32>} : memref<1x1x1x4xf32, #tpu.memory_space<vmem>>, vector<1x1x1x4xf32>,
      %cst_32 = arith.constant 0.000000e+00 : f32
      %37 = vector.broadcast %cst_32 : f32 to vector<1x1x1x4xf32>
      %c0_33 = arith.constant 0 : index
      %c0_34 = arith.constant 0 : index
      %c0_35 = arith.constant 0 : index
      %c0_36 = arith.constant 0 : index
      %38 = vector.load %arg6[%c0_33, %c0_34, %c0_35, %c0_36] : memref<1x1x1x4xf32, #tpu.memory_space<vmem>>, vector<1x1x1x4xf32>
      tpu.vector_store %arg6[%c0_33, %c0_34, %c0_35, %c0_36], %37 {strides = array<i32>} : memref<1x1x1x4xf32, #tpu.memory_space<vmem>>, vector<1x1x1x4xf32>,
    } else {
    }
    %c0 = arith.constant 0 : index
    %c0_1 = arith.constant 0 : index
    %c0_2 = arith.constant 0 : index
    %3 = vector.load %arg3[%c0, %c0_1, %c0_2] : memref<1x4x256xf32, #tpu.memory_space<vmem>>, vector<1x4x256xf32>
    %c0_3 = arith.constant 0 : index
    %c0_4 = arith.constant 0 : index
    %c0_5 = arith.constant 0 : index
    %4 = vector.load %arg4[%c0_3, %c0_4, %c0_5] : memref<1x1x256xi8, #tpu.memory_space<vmem>>, vector<1x1x256xi8>
    %5 = arith.extsi %4 : vector<1x1x256xi8> to vector<1x1x256xi32>
    %cst = arith.constant dense<0xFF800000> : vector<1x256xf32>
    %6 = vector.multi_reduction <maximumf>, %3, %cst [1] : vector<1x4x256xf32> to vector<1x256xf32>
    %7 = vector.shape_cast %6 : vector<1x256xf32> to vector<1x1x256xf32>
    %8 = vector.broadcast %7 : vector<1x1x256xf32> to vector<1x4x256xf32>
    %9 = arith.subf %3, %8 : vector<1x4x256xf32>
    %10 = math.exp %9 : vector<1x4x256xf32>
    %cst_6 = arith.constant dense<0.000000e+00> : vector<1x256xf32>
    %11 = vector.multi_reduction <add>, %10, %cst_6 [1] : vector<1x4x256xf32> to vector<1x256xf32>
    %12 = vector.shape_cast %11 : vector<1x256xf32> to vector<1x1x256xf32>
    %13 = tpu.reciprocal %12 : vector<1x1x256xf32> -> vector<1x1x256xf32>
    %14 = vector.broadcast %13 : vector<1x1x256xf32> to vector<1x4x256xf32>
    %15 = arith.mulf %10, %14 : vector<1x4x256xf32>
    %16 = tpu.iota {dimensions = array<i32: 1>} : vector<1x4x1xi32>
    %17 = vector.broadcast %5 : vector<1x1x256xi32> to vector<1x4x256xi32>
    %18 = vector.broadcast %16 : vector<1x4x1xi32> to vector<1x4x256xi32>
    %19 = arith.cmpi eq, %17, %18 : vector<1x4x256xi32>
    %c0_7 = arith.constant 0 : index
    %c0_8 = arith.constant 0 : index
    %c0_9 = arith.constant 0 : index
    %c0_10 = arith.constant 0 : index
    %20 = vector.load %arg5[%c0_7, %c0_8, %c0_9, %c0_10] : memref<1x1x1x4xf32, #tpu.memory_space<vmem>>, vector<1x1x1x4xf32>
    %cst_11 = arith.constant 0.000000e+00 : f32
    %21 = vector.broadcast %cst_11 : f32 to vector<1x4x256xf32>
    %22 = arith.select %19, %15, %21 : vector<1x4x256xi1>, vector<1x4x256xf32>
    %cst_12 = arith.constant dense<0.000000e+00> : vector<1x4xf32>
    %23 = vector.multi_reduction <add>, %22, %cst_12 [2] : vector<1x4x256xf32> to vector<1x4xf32>
    %24 = vector.shape_cast %23 : vector<1x4xf32> to vector<1x1x1x4xf32>
    %25 = arith.addf %20, %24 : vector<1x1x1x4xf32>
    %c0_13 = arith.constant 0 : index
    %c0_14 = arith.constant 0 : index
    %c0_15 = arith.constant 0 : index
    %c0_16 = arith.constant 0 : index
    %26 = vector.load %arg5[%c0_13, %c0_14, %c0_15, %c0_16] : memref<1x1x1x4xf32, #tpu.memory_space<vmem>>, vector<1x1x1x4xf32>
    tpu.vector_store %arg5[%c0_13, %c0_14, %c0_15, %c0_16], %25 {strides = array<i32>} : memref<1x1x1x4xf32, #tpu.memory_space<vmem>>, vector<1x1x1x4xf32>,
    %c0_17 = arith.constant 0 : index
    %c0_18 = arith.constant 0 : index
    %c0_19 = arith.constant 0 : index
    %c0_20 = arith.constant 0 : index
    %27 = vector.load %arg6[%c0_17, %c0_18, %c0_19, %c0_20] : memref<1x1x1x4xf32, #tpu.memory_space<vmem>>, vector<1x1x1x4xf32>
    %cst_21 = arith.constant 1.000000e+00 : f32
    %28 = vector.broadcast %cst_21 : f32 to vector<1x4x256xf32>
    %29 = arith.addf %15, %28 : vector<1x4x256xf32>
    %30 = arith.select %19, %29, %15 : vector<1x4x256xi1>, vector<1x4x256xf32>
    %cst_22 = arith.constant dense<0.000000e+00> : vector<1x4xf32>
    %31 = vector.multi_reduction <add>, %30, %cst_22 [2] : vector<1x4x256xf32> to vector<1x4xf32>
    %32 = vector.shape_cast %31 : vector<1x4xf32> to vector<1x1x1x4xf32>
    %33 = arith.addf %27, %32 : vector<1x1x1x4xf32>
    %c0_23 = arith.constant 0 : index
    %c0_24 = arith.constant 0 : index
    %c0_25 = arith.constant 0 : index
    %c0_26 = arith.constant 0 : index
    %34 = vector.load %arg6[%c0_23, %c0_24, %c0_25, %c0_26] : memref<1x1x1x4xf32, #tpu.memory_space<vmem>>, vector<1x1x1x4xf32>
    tpu.vector_store %arg6[%c0_23, %c0_24, %c0_25, %c0_26], %33 {strides = array<i32>} : memref<1x1x1x4xf32, #tpu.memory_space<vmem>>, vector<1x1x1x4xf32>,
    return
  }
  func.func @transform_0(%arg0: i32, %arg1: i32, %arg2: i32) -> (i32, i32, i32) {
    %c1_i32 = arith.constant 1 : i32
    %0 = arith.muli %arg1, %c1_i32 : i32
    %1 = arith.addi %0, %arg2 : i32
    %c0_i32 = arith.constant 0 : i32
    %c0_i32_0 = arith.constant 0 : i32
    return %arg0, %c0_i32, %1 : i32, i32, i32
  }
  func.func @transform_1(%arg0: i32, %arg1: i32, %arg2: i32) -> (i32, i32, i32) {
    %c1_i32 = arith.constant 1 : i32
    %0 = arith.muli %arg1, %c1_i32 : i32
    %1 = arith.addi %0, %arg2 : i32
    %c0_i32 = arith.constant 0 : i32
    %c0_i32_0 = arith.constant 0 : i32
    return %arg0, %c0_i32, %1 : i32, i32, i32
  }
  func.func @transform_2(%arg0: i32, %arg1: i32, %arg2: i32) -> (i32, i32, i32, i32) {
    %c0_i32 = arith.constant 0 : i32
    %c0_i32_0 = arith.constant 0 : i32
    %c0_i32_1 = arith.constant 0 : i32
    return %arg0, %arg1, %c0_i32, %c0_i32_0 : i32, i32, i32, i32
  }
  func.func @transform_3(%arg0: i32, %arg1: i32, %arg2: i32) -> (i32, i32, i32, i32) {
    %c0_i32 = arith.constant 0 : i32
    %c0_i32_0 = arith.constant 0 : i32
    %c0_i32_1 = arith.constant 0 : i32
    return %arg0, %arg1, %c0_i32, %c0_i32_0 : i32, i32, i32, i32
  }
}

</mosaic_0001>

<bundles_post_ra>
// kernel: tpu_custom_call.1
= control target key start
LH: loop header
LB: loop body
LE: loop exit
PB: predicated region body
PF: predicated region fallthrough
CT: control target
= control target key end

     0   :  { %9 = vsyncpa [#allocation3], 0  ;;  %s1190_s0 = inlined_call_operand.hbm [shape: f32[2,4,256], index: 0, kind: input, shape index: {}]   ;;  %s1191_s1 = inlined_call_operand.vmem [shape: s8[2,1,256], index: 1, kind: input, shape index: {}]   ;;  %s1192_s2 = inlined_call_operand.hbm [shape: f32[2,1,1,4], index: 2, kind: output, shape index: {0}]   ;;  %s1193_s3 = inlined_call_operand.hbm [shape: f32[2,1,1,4], index: 3, kind: output, shape index: {1}]  }
   0x1   :  { %11 = vsyncpa [#allocation3 + $0x1], 0 }
   0x2   :  { %12 = vsyncpa [#allocation4], 0 }
   0x3   :  { %14 = vsyncpa [#allocation4 + $0x1], 0 }
   0x4   :  { %15 = vsyncpa [#allocation7], 0 }
   0x5   :  { %17 = vsyncpa [#allocation7 + $0x1], 0  ;;  %s927_s12 = smov 0   ;;  %s929_s13 = smov 0  }
   0x6   :  { %s931_s14 = smov 0   ;;  %s933_s15 = smov 0  }
   0x7   :  { %s935_s16 = smov 0   ;;  %s937_s17 = smov 0  }
   0x8 LB: > { %s661_s18 = sadd.s32 4294967295, %s899_s17   ;;  %s662_s19 = sadd.s32 4294967294, %s899_s17   ;;  %s899_s17 = sphi %s937_s17, %s23_s17   ;;  %s895_s16 = sphi %s935_s16, %s1209_s16   ;;  %s891_s15 = sphi %s933_s15, %s1208_s15   ;;  %s887_s14 = sphi %s931_s14, %s1207_s14   ;;  %s883_s13 = sphi %s929_s13, %s1206_s13   ;;  %s879_s12 = sphi %s927_s12, %s1205_s12  }
   0x9   : > { %s42_s20 = sadd.s32 1, %s895_s16  ;;  %s53_s21 = sadd.s32 1, %s887_s14 }
   0xa   : > { %p44_p0 = scmp.ge.s32.totalorder %s42_s20, 2  ;;  %p60_p1 = scmp.ne.s32.totalorder %s887_s14, %s883_s13 }
   0xb   : > { %p61_p2 = scmp.eq.s32.totalorder %s899_s17, 0  ;;  %p66_p3 = scmp.ne.s32.totalorder %s883_s13, %s879_s12 }
   0xc   : > { %s1211_s20 = smov (%p44_p0, %s42_s20), 0  ;;  %p67_p5 = scmp.eq.s32.totalorder %s661_s18, 0 }
   0xd   : > { %p968_p4 = por %p61_p2, %p60_p1  ;;  %s48_s23 = ssub.s32 %s895_s16, %s1211_s20 }
   0xe   : > { %p122_p6 = scmp.eq.s32.totalorder %s661_s18, 1  ;;  %p51_p7 = scmp.eq.s32.totalorder %s48_s23, 0 }
   0xf   : > { %p974_p8 = por %p67_p5, %p66_p3  ;;  %p128_p10 = scmp.eq.s32.totalorder %s662_s19, 1 }
  0x10   : > { %p978_p9 = por %p122_p6, %p60_p1  ;;  %p693_p13 = scmp.lt.s32.totalorder %s899_s17, 2 }
  0x11   : > { %s983_s26 = scalar_select %p51_p7, %s887_s14, %s53_s21  }
  0x12   : > { %s1197_s25 = scalar_select %p978_p9, 1, 0 }
  0x13   : > { %p985_p11 = por %p128_p10, %p66_p3  ;;  %s176_s28 = sand.u32 1, %s887_s14  }
  0x14   : > { %s665_s29 = sshll.u32 %s176_s28, 3  ;;  %s675_s30 = sshll.u32 %s895_s16, 7 }
  0x15   : > { %s1198_s27 = scalar_select %p985_p11, 1, 0 }
  0x16   : > { %s996_s6 = scalar_lea.hbm %s1190_s0, %s675_s30  ;;  %s180_s7 = scalar_lea.vmem [#allocation2], %s665_s29 }
  0x17   : > { %s191_s8 = sshll.u32 %s180_s7, 4  ;;  %p1002_p0 = pnand %p693_p13, %p968_p4  ;;  %s998_s8 = int_to_ptr.vmem [resolvable:$true] %s191_s8 }
  0x18   : > { %s177_s10 = scalar_lea.sflag [#allocation3], %s176_s28  ;;  %s755_s11 = scalar_lea.hbm %s996_s6, 128 }
  0x19   : > { %p756_p3 = scmp.ne.s32.totalorder %s996_s6, %s755_s11  ;;  %p757_p5 = pneg %p1002_p0 }
  0x1a   : > { %s760_s21 = scalar_lea.hbm %s1190_s0, 256  ;;  %p761_p4 = scmp.lt.u32.totalorder %s996_s6, %s1190_s0 }
  0x1b   : > { %p758_p6 = pnand %p757_p5, %p756_p3  ;;  %p762_p10 = scmp.lt.u32.totalorder %s760_s21, %s755_s11 }
  0x1c   : > { %p764_p12 = scmp.lt.u32.totalorder %s755_s11, %s996_s6 }
  0x1d   : > { %p759_p7 = pneg %p758_p6  ;;  %p763_p13 = por %p762_p10, %p761_p4 }
  0x1f   : > { %p765_p1 = por %p764_p12, %p763_p13 }
  0x21   : > { %p766_p2 = pnand %p765_p1, %p759_p7 }
  0x23   : > { %769 = shalt.err (!%p766_p2)
}
  0x24   : > { %s770_s28 = scalar_lea.vmem %s998_s8, 128  ;;  %s901_s29 = smov [#allocation2]  }
  0x25   : > { %p771_p3 = scmp.ne.s32.totalorder %s998_s8, %s770_s28  ;;  %s775_s30 = sshll.u32 %s901_s29, 4  ;;  %s776_s30 = int_to_ptr.vmem [resolvable:$false] %s775_s30 }
  0x26   : > { %s777_s4 = scalar_lea.vmem %s776_s30, 256  ;;  %p778_p9 = scmp.lt.s32.totalorder %s998_s8, %s776_s30 }
  0x27   : > { %p773_p6 = pnand %p771_p3, %p757_p5  ;;  %p779_p4 = scmp.lt.s32.totalorder %s777_s4, %s770_s28 }
  0x29   : > { %p774_p11 = pneg %p773_p6  ;;  %p780_p10 = por %p779_p4, %p778_p9 }
  0x2b   : > { %p781_p12 = pnand %p780_p10, %p774_p11 }
  0x2d   : > { %784 = shalt.err (!%p781_p12)
}
  0x2e   : > { %685 = dma.hbm_to_vmem [thread:$0]  (!%p1002_p0), %s996_s6, 128, %s998_s8, %s177_s10  }
  0x2f   : > { %p1200_p1 = scmp.lt.s32.totalorder %s899_s17, 3  ;;  %p1201_p2 = scmp.ge.s32.totalorder %s899_s17, 1 }
  0x31   : > { %p211_p5 = pnand %p1201_p2, %p1200_p1 }
  0x32   : > { %s1038_s5 = sand.u32 (!%p211_p5), 1, %s883_s13  }
  0x33   : > { %214 = sbr.rel (%p211_p5) target bundleno = 454 (0x1c6), region = 28  ;;  %s669_s7 = sshll.u32 (!%p211_p5), %s1038_s5, 3 }
  0x34   : > { %s217_s11 = scalar_lea.sflag (!%p211_p5), [#allocation3], %s1038_s5  ;;  %s220_s18 = scalar_lea.vmem (!%p211_p5), [#allocation2], %s669_s7 }
  0x3a   : > { %866 = dma.done.wait (%p974_p8), %s217_s11, 128  }
  0x3b   : > { %868 = vsyncadd (%p974_p8), %s217_s11, 4294967168  ;;  %vm281_vm0 = vcmask 1043456   ;;  %v275_v0 = vld [vmem:[%s220_s18] sm:$0xff]  ;;  %p259_p8 = scmp.lt.s32.totalorder %s891_s15, 1  ;;  %v327_v30 = vlaneseq  ;;  %v902_v62 = vmov 0   ;;  %vm272_vm3 = vcmask 24576  }
  0x3c   : > { %v279_v1 = vcombine.high %v275_v0, %v275_v0  ;;  %v282_v2 = vsel %vm281_vm0, %v275_v0, -inf  ;;  %746 = vset.pattern.permute.xlu1 %v902_v62  ;;  %747 = vset.pattern.permute.xlu0 %v902_v62  ;;  %s1067_s19 = scalar_lea.vmem [#allocation5], %s1038_s5  ;;  %v903_v63 = vmov 0.0   ;;  %s1084_s21 = scalar_lea.vmem [#allocation6], %s1038_s5 }
  0x3d   : > { %v283_v3 = vrot.slane %v282_v2, 4  ;;  %s260_s24 = scalar_select %p259_p8, %s891_s15, 1  ;;  %v1056_v35 = vshrl.u32 %v327_v30, 7  ;;  %273 = vst.msk [vmem:[%s1067_s19] sm:$0x1] %vm272_vm3, %v903_v63 }
  0x3e   : > { %v289_v4 = vsel %vm281_vm0, %v279_v1, -inf  ;;  %274 = vst.msk [vmem:[%s1084_s21] sm:$0x1] %vm272_vm3, %v903_v63  ;;  %s671_s22 = sshll.u32 %s891_s15, 4  ;;  %s521_s23 = sshll.u32 %s1067_s19, 4  ;;  %s1103_s23 = int_to_ptr.vmem [resolvable:$true] %s521_s23 }
  0x3f   : > { %v284_v5 = vmax.f32 %v282_v2, %v283_v3  ;;  %v290_v6 = vrot.slane %v289_v4, 4  ;;  %s670_s6 = sshll.u32 %s260_s24, 1  ;;  %v331_v39 = vsub.s32 0, %v1056_v35  ;;  %v335_v40 = vsub.s32 4, %v1056_v35  ;;  %s1101_s30 = scalar_lea.hbm %s1192_s2, %s671_s22 }
  0x40   : > { %s265_s10 = scalar_lea.vmem %s1191_s1, %s670_s6  ;;  %v365_v2 = vsub.s32 1, %v1056_v35  ;;  %v369_v3 = vsub.s32 2, %v1056_v35  ;;  %s535_s4 = sshll.u32 %s1084_s21, 4  ;;  %s1141_s4 = int_to_ptr.vmem [resolvable:$true] %s535_s4 }
  0x41   : > { %v285_v7 = vrot.slane %v284_v5, 2  ;;  %v291_v8 = vmax.f32 %v289_v4, %v290_v6  ;;  %v276_v36 = vld [vmem:[%s265_s10] sm:$0x3]  ;;  %v373_v4 = vsub.s32 3, %v1056_v35  ;;  %s504_s7 = scalar_lea.sflag [#allocation4], %s1038_s5  ;;  %s785_s11 = scalar_lea.vmem %s1103_s23, 16 }
  0x42   : > { %v277_v38 = vunpack.c.0.s8 %v276_v36  ;;  %p786_p9 = scmp.ne.s32.totalorder %s1103_s23, %s785_s11  ;;  %p1202_p11 = scmp.ne.s32.totalorder %s1197_s25, 0 }
  0x43   : > { %v286_v9 = vmax.f32 %v284_v5, %v285_v7  ;;  %v292_v10 = vrot.slane %v291_v8, 2  ;;  %s905_s18 = smov [#allocation5]  }
  0x44   : > { %v332_v41 = vrot.slane %v277_v38, %v331_v39  ;;  %v336_v42 = vrot.slane %v277_v38, %v335_v40  ;;  %v347_v36 = vld [vmem:[%s1067_s19] sm:$0x1]  ;;  %p787_p0 = pnand %p786_p9, %p1202_p11  ;;  %s789_s24 = sshll.u32 %s905_s18, 4  ;;  %s790_s24 = int_to_ptr.vmem [resolvable:$false] %s789_s24 }
  0x45   : > { %v287_v11 = vrot.slane %v286_v9, 1  ;;  %v293_v12 = vmax.f32 %v291_v8, %v292_v10  ;;  %s791_s6 = scalar_lea.vmem %s790_s24, 32  ;;  %p792_p13 = scmp.lt.s32.totalorder %s1103_s23, %s790_s24 }
  0x46   : > { %v340_v44 = vrot.slane %v332_v41, %v331_v39  ;;  %v344_v46 = vrot.slane %v336_v42, %v331_v39  ;;  %p788_p7 = pneg %p787_p0  ;;  %p793_p3 = scmp.lt.s32.totalorder %s791_s6, %s785_s11 }
  0x47   : > { %v288_v13 = vmax.f32 %v286_v9, %v287_v11  ;;  %v294_v14 = vrot.slane %v293_v12, 1 }
  0x48   : > { %vm345_vm1 = vcmp.eq.s32.totalorder %v340_v44, %v1056_v35  ;;  %vm346_vm2 = vcmp.eq.s32.totalorder %v344_v46, %v1056_v35  ;;  %p794_p6 = por %p793_p3, %p792_p13 }
  0x49   : > { %v295_v15 = vmax.f32 %v293_v12, %v294_v14 }
  0x4a   : > { %p795_p4 = pnand %p794_p6, %p788_p7 }
  0x4b   : > { %v298_v16 = vcombine.low %v288_v13, %v295_v15 }
  0x4d   : > { %v300_v17 = vsub.f32 %v275_v0, %v298_v16  ;;  %v904_v0 = vmov 1966171168  }
  0x4e   : > { %v378_v1 = vunpack.c.l.s4 %v904_v0 }
  0x4f   : > { %v301_v18 = vmul.f32 1.442695, %v300_v17 }
  0x50   : > { %v379_v5 = vunpack.c.0.s8 %v378_v1 }
  0x51   : > { %749 = vpow2.f32 %v301_v18 }
  0x52   : > { %v1075_v11 = vsub.s32 %v379_v5, %v1056_v35 }
  0x5b   : > { %v750_v19 = vpop.eup %749 }
  0x5c   : > { %v304_v20 = vcombine.high %v750_v19, %v750_v19  ;;  %v306_v21 = vsel %vm281_vm0, %v750_v19, 0.0 }
  0x5d   : > { %v307_v22 = vrot.slane %v306_v21, 4 }
  0x5e   : > { %v313_v23 = vsel %vm281_vm0, %v304_v20, 0.0 }
  0x5f   : > { %v308_v24 = vadd.f32 %v307_v22, %v306_v21  ;;  %v314_v25 = vrot.slane %v313_v23, 4 }
  0x61   : > { %v309_v26 = vrot.slane %v308_v24, 2  ;;  %v315_v27 = vadd.f32 %v314_v25, %v313_v23 }
  0x63   : > { %v310_v28 = vadd.f32 %v309_v26, %v308_v24  ;;  %v316_v29 = vrot.slane %v315_v27, 2 }
  0x65   : > { %v311_v31 = vrot.slane %v310_v28, 1  ;;  %v317_v32 = vadd.f32 %v316_v29, %v315_v27  ;;  %v403_v29 = vand.u32 127, %v327_v30 }
  0x67   : > { %v312_v33 = vadd.f32 %v311_v31, %v310_v28  ;;  %v318_v34 = vrot.slane %v317_v32, 1  ;;  %v406_v31 = vsub.s32 %v403_v29, %v1056_v35  ;;  %v426_v35 = vld [vmem:[%s1084_s21] sm:$0x1] }
  0x69   : > { %v319_v37 = vadd.f32 %v318_v34, %v317_v32  ;;  %751 = vrcp.f32 %v312_v33 }
  0x6b   : > { %753 = vrcp.f32 %v319_v37 }
  0x73   : > { %v752_v43 = vpop.eup %751 }
  0x75   : > { %v754_v45 = vpop.eup %753 }
  0x76   : > { %v324_v47 = vcombine.low %v752_v43, %v754_v45 }
  0x78   : > { %v326_v48 = vmul.f32 %v750_v19, %v324_v47 }
  0x7a   : > { %v349_v49 = vcombine.high %v326_v48, %v326_v48  ;;  %v351_v50 = vsel %vm345_vm1, %v326_v48, 0.0  ;;  %v427_v51 = vadd.f32 1.0, %v326_v48 }
  0x7b   : > { %v353_v52 = vsel %vm281_vm0, %v351_v50, 0.0 }
  0x7c   : > { %v352_v53 = vsel %vm346_vm2, %v349_v49, 0.0  ;;  %v429_v54 = vcombine.high %v427_v51, %v427_v51  ;;  %v431_v55 = vsel %vm345_vm1, %v427_v51, %v326_v48 }
  0x7d   : > { %v354_v56 = vsel %vm281_vm0, %v352_v53, 0.0  ;;  %v433_v57 = vsel %vm281_vm0, %v431_v55, 0.0 }
  0x7e   : > { %v355_v58 = vadd.f32 %v354_v56, %v353_v52  ;;  %v432_v59 = vsel %vm346_vm2, %v429_v54, %v349_v49 }
  0x7f   : > { %v434_v60 = vsel %vm281_vm0, %v432_v59, 0.0 }
  0x80   : > { %356 = vadd.xlane.f32.xlu0 %v355_v58  ;;  %v435_v61 = vadd.f32 %v434_v60, %v433_v57 }
  0x84   : > { %436 = vadd.xlane.f32.xlu0 %v435_v61 }
 0x10d   : > { %v357_v6 = vpop.xlane.xlu0 %356 }
 0x10e   : > { %v362_v7 = vrot.slane %v357_v6, %v331_v39  ;;  %v366_v8 = vrot.slane %v357_v6, %v365_v2  ;;  %v370_v9 = vrot.slane %v357_v6, %v369_v3  ;;  %v374_v10 = vrot.slane %v357_v6, %v373_v4 }
 0x110   : > { %v375_v12 = vcombine.low %v362_v7, %v366_v8  ;;  %v376_v13 = vcombine.low %v370_v9, %v374_v10 }
 0x111   : > { %v437_v14 = vpop.xlane.xlu0 %436 }
 0x112   : > { %v442_v15 = vrot.slane %v437_v14, %v331_v39  ;;  %v446_v16 = vrot.slane %v437_v14, %v365_v2  ;;  %v450_v17 = vrot.slane %v437_v14, %v369_v3  ;;  %v454_v18 = vrot.slane %v437_v14, %v373_v4 }
 0x113   : > { %v383_v19 = vrot.slane %v375_v12, %v1075_v11  ;;  %v390_v20 = vrot.slane %v376_v13, %v1075_v11 }
 0x114   : > { %v455_v21 = vcombine.low %v442_v15, %v446_v16  ;;  %v456_v22 = vcombine.low %v450_v17, %v454_v18 }
 0x115   : > { %v391_v23 = vcombine.low %v383_v19, %v390_v20 }
 0x116   : > { %v463_v24 = vrot.slane %v455_v21, %v1075_v11  ;;  %v470_v25 = vrot.slane %v456_v22, %v1075_v11 }
 0x117   : > { %v398_v26 = vrot.slane %v391_v23, %v1075_v11 }
 0x118   : > { %v471_v27 = vcombine.low %v463_v24, %v470_v25 }
 0x119   : > { %400 = vperm.xlu1 %746, %v398_v26  }
 0x11a   : > { %v478_v28 = vrot.slane %v471_v27, %v1075_v11 }
 0x11d   : > { %480 = vperm.xlu1 %746, %v478_v28  }
 0x198   : > { %v401_v32 = vpop.permute.xlu1 %400 }
 0x199   : > { %v407_v33 = vrot.slane %v401_v32, %v406_v31 }
 0x19b   : > { %v414_v34 = vrot.slane %v407_v33, %v1075_v11 }
 0x19c   : > { %v481_v37 = vpop.permute.xlu1 %480 }
 0x19d   : > { %v421_v38 = vrot.slane %v414_v34, %v1075_v11  ;;  %v485_v39 = vrot.slane %v481_v37, %v406_v31 }
 0x19f   : > { %v423_v40 = vadd.f32 %v421_v38, %v347_v36  ;;  %v492_v30 = vrot.slane %v485_v39, %v1075_v11 }
 0x1a1   : > { %425 = vst.msk [vmem:[%s1067_s19] sm:$0x1] %vm272_vm3, %v423_v40  ;;  %v499_v41 = vrot.slane %v492_v30, %v1075_v11 }
 0x1a2   : > { %798 = shalt.err (!%p795_p4)
}
 0x1a3   : > { %s799_s8 = scalar_lea.hbm %s1101_s30, 16  ;;  %s803_s19 = scalar_lea.hbm %s1192_s2, 32 }
 0x1a4   : > { %p800_p10 = scmp.ne.s32.totalorder %s1101_s30, %s799_s8  ;;  %p804_p2 = scmp.lt.u32.totalorder %s1101_s30, %s1192_s2 }
 0x1a5   : > { %p805_p5 = scmp.lt.u32.totalorder %s803_s19, %s799_s8  ;;  %p807_p9 = scmp.lt.u32.totalorder %s799_s8, %s1101_s30 }
 0x1a6   : > { %p801_p12 = pnand %p800_p10, %p1202_p11 }
 0x1a7   : > { %p806_p8 = por %p805_p5, %p804_p2 }
 0x1a8   : > { %p802_p1 = pneg %p801_p12 }
 0x1a9   : > { %p808_p0 = por %p807_p9, %p806_p8 }
 0x1ab   : > { %p809_p7 = pnand %p808_p0, %p802_p1 }
 0x1ad   : > { %812 = shalt.err (!%p809_p7)
}
 0x1ae   : > { %678 = dma.vmem_to_hbm [thread:$0]  (%p1202_p11), %s1103_s23, 16, %s1101_s30, %s504_s7   ;;  %v501_v42 = vadd.f32 %v499_v41, %v426_v35 }
 0x1af   : > { %s1137_s24 = scalar_lea.hbm %s1193_s3, %s671_s22  ;;  %s508_s6 = scalar_lea.sflag [#allocation7], %s1038_s5 }
 0x1b0   : > { %502 = vst.msk [vmem:[%s1084_s21] sm:$0x1] %vm272_vm3, %v501_v42  ;;  %s813_s8 = scalar_lea.vmem %s1141_s4, 16  ;;  %s906_s15 = smov [#allocation6]  }
 0x1b1   : > { %p814_p13 = scmp.ne.s32.totalorder %s1141_s4, %s813_s8  ;;  %s817_s23 = sshll.u32 %s906_s15, 4  ;;  %s818_s23 = int_to_ptr.vmem [resolvable:$false] %s817_s23 }
 0x1b2   : > { %s819_s30 = scalar_lea.vmem %s818_s23, 32  ;;  %p820_p4 = scmp.lt.s32.totalorder %s1141_s4, %s818_s23 }
 0x1b3   : > { %p815_p3 = pnand %p814_p13, %p1202_p11  ;;  %p821_p10 = scmp.lt.s32.totalorder %s819_s30, %s813_s8 }
 0x1b5   : > { %p816_p6 = pneg %p815_p3  ;;  %p822_p12 = por %p821_p10, %p820_p4 }
 0x1b7   : > { %p823_p1 = pnand %p822_p12, %p816_p6 }
 0x1b9   : > { %826 = shalt.err (!%p823_p1)
}
 0x1ba   : > { %s827_s5 = scalar_lea.hbm %s1137_s24, 16  ;;  %s831_s7 = scalar_lea.hbm %s1193_s3, 32 }
 0x1bb   : > { %p828_p2 = scmp.ne.s32.totalorder %s1137_s24, %s827_s5  ;;  %p832_p9 = scmp.lt.u32.totalorder %s1137_s24, %s1193_s3 }
 0x1bc   : > { %p833_p0 = scmp.lt.u32.totalorder %s831_s7, %s827_s5  ;;  %p835_p13 = scmp.lt.u32.totalorder %s827_s5, %s1137_s24 }
 0x1bd   : > { %p829_p5 = pnand %p828_p2, %p1202_p11 }
 0x1be   : > { %p834_p7 = por %p833_p0, %p832_p9 }
 0x1bf   : > { %p830_p8 = pneg %p829_p5 }
 0x1c0   : > { %p836_p3 = por %p835_p13, %p834_p7 }
 0x1c2   : > { %p837_p6 = pnand %p836_p3, %p830_p8 }
 0x1c4   : > { %840 = shalt.err (!%p837_p6)
}
 0x1c5   : > { %679 = dma.vmem_to_hbm [thread:$0]  (%p1202_p11), %s1141_s4, 16, %s1137_s24, %s508_s6  }
 0x1c6 PF: > { %s547_s19 = sand.u32 1, %s879_s12   ;;  %p1203_p4 = scmp.ne.s32.totalorder %s1198_s27, 0 }
 0x1c7   : > { %p1204_p10 = scmp.ge.s32.totalorder %s899_s17, 2  ;;  %s548_s28 = scalar_lea.sflag [#allocation4], %s547_s19 }
 0x1c9   : > { %p687_p12 = pnand %p1204_p10, %p1203_p4 }
 0x1cb   : > { %870 = dma.done.wait (!%p687_p12), %s548_s28, 16  }
 0x1cc   : > { %872 = vsyncadd (!%p687_p12), %s548_s28, 4294967280  ;;  %s556_s29 = scalar_lea.sflag [#allocation7], %s547_s19 }
 0x1cd   : > { %874 = dma.done.wait (!%p687_p12), %s556_s29, 16  }
 0x1ce   : > { %876 = vsyncadd (!%p687_p12), %s556_s29, 4294967280  ;;  %s23_s17 = sadd.s32 1, %s899_s17   ;;  %s1205_s12 = smov %s883_s13 }
 0x1cf   : > { %p20_p1 = scmp.ge.s32.totalorder %s23_s17, 4   ;;  %s1206_s13 = smov %s887_s14 }
 0x1d0   : > { %s1207_s14 = smov %s983_s26  ;;  %s1208_s15 = smov %s895_s16 }
 0x1d1   : > { %s1209_s16 = smov %s1211_s20  ;;  %22 = sbr.rel (!%p20_p1) target bundleno = 8 (0x8), region = 97 }
 0x1d8   :  { %560 = vsyncpa [#allocation3], 1 }
 0x1d9   :  { %562 = vsyncpa [#allocation3 + $0x1], 1 }
 0x1da   :  { %563 = vsyncpa [#allocation4], 1 }
 0x1db   :  { %565 = vsyncpa [#allocation4 + $0x1], 1 }
 0x1dc   :  { %566 = vsyncpa [#allocation7], 1 }
 0x1dd   :  { %568 = vsyncpa [#allocation7 + $0x1], 1 }

</bundles_post_ra>
